<compile_context>
chip_gen: v6e
topology: v6e:2x2x1
jax: 0.10.0
libtpu: 0.0.40
codegen_flags: <defaults>
</compile_context>

<pallas_src>
import functools

import jax
import jax.numpy as jnp
from jax.experimental import pallas as pl
from jax.experimental.pallas import tpu as pltpu


def find_multiple(n: int, k: int) -> int:
    return n if n % k == 0 else n + k - (n % k)


# ----------------------------- Pallas kernel ------------------------------ #
def _int4_matmul_kernel(x_ref, wp_ref, sz_ref, o_ref, *, groupsize, groups_per_tile):
    """One (tm, tn) output tile, accumulating over the K grid axis.

    x_ref:  (tm, tk)                 bf16 activations, tk = groups_per_tile * groupsize
    wp_ref: (tk // 2, tn)            uint8 packed int4 (hi nibble = 1st half of each group)
    sz_ref: (groups_per_tile, 2, tn) f32, [:,0,:] = scale, [:,1,:] = zero - 8*scale
    o_ref:  (tm, tn)                 f32, resident across the K grid axis (accumulator)
    """
    k = pl.program_id(2)

    @pl.when(k == 0)
    def _():
        o_ref[...] = jnp.zeros_like(o_ref)

    gs = groupsize
    half = gs // 2

    acc = None
    for g in range(groups_per_tile):                       # small, statically unrolled
        # Unpack int4 nibbles; values 0..15 are exact in bf16.
        packed = wp_ref[g * half:(g + 1) * half, :].astype(jnp.int32)   # (half, tn)
        w_hi = (packed >> 4).astype(jnp.bfloat16)
        w_lo = (packed & 0xF).astype(jnp.bfloat16)

        x_g = x_ref[:, g * gs:(g + 1) * gs]                # (tm, gs) bf16, one load
        x_hi = x_g[:, :half]
        x_lo = x_g[:, half:]

        # Raw int4 matmuls on the MXU (no per-element dequant, no concat).
        partial = jnp.dot(x_hi, w_hi, preferred_element_type=jnp.float32)
        partial = partial + jnp.dot(x_lo, w_lo, preferred_element_type=jnp.float32)

        # Per-group activation row-sum carries the affine (zero - 8*scale) term.
        xsum = jnp.sum(x_g.astype(jnp.float32), axis=1, keepdims=True)  # (tm, 1)

        scale = sz_ref[g, 0:1, :]                          # (1, tn) f32
        zb = sz_ref[g, 1:2, :]                             # (1, tn) f32 = zero - 8*scale

        contrib = partial * scale + xsum * zb
        acc = contrib if acc is None else acc + contrib

    o_ref[...] += acc


# ------------------------------ JAX wrapper ------------------------------- #
def weight_only_int4_linear(x, weight_packed, scales_and_zeros, *,
                            out_features, groupsize, origin_in_features=None):
    """x: (..., origin_in_features) f32; weight_packed: (K//2, N) uint8;
    scales_and_zeros: (K//groupsize, N, 2) f32."""
    K = weight_packed.shape[0] * 2
    N = out_features
    G = K // groupsize
    assert groupsize % 128 == 0, "kernel requires groupsize to be a multiple of 128"
    assert K % groupsize == 0
    assert scales_and_zeros.shape == (G, N, 2)

    orig_shape = x.shape
    # Padding branch of the module (in_features rounded up to multiple of 1024).
    if origin_in_features is not None and origin_in_features != K:
        pad_spec = [(0, 0)] * (x.ndim - 1) + [(0, K - origin_in_features)]
        x = jnp.pad(x, pad_spec)

    # bf16 activations -> native MXU path (CUDA reference path also runs bf16).
    x2d = x.reshape(-1, K).astype(jnp.bfloat16)
    M = x2d.shape[0]

    # --- tile policy --------------------------------------------------------
    # M: pad to a multiple of 16 (bf16 sublane packing); cap the M tile at 256.
    tm = min(256, find_multiple(max(M, 16), 16))
    Mp = find_multiple(max(M, tm), tm)
    if Mp != M:
        x2d = jnp.pad(x2d, ((0, Mp - M), (0, 0)))

    # N: pad to a multiple of 128, pick the largest lane-dense tn <= 2048 dividing Np.
    Np = find_multiple(N, 128)
    tn = 128
    for mult in range(min(Np // 128, 16), 0, -1):
        cand = 128 * mult
        if Np % cand == 0:
            tn = cand
            break

    # K: cover several quantization groups per step (tk <= 512) to shrink the grid.
    max_gpt = max(1, 512 // groupsize)
    gpt = 1
    for cand in range(min(G, max_gpt), 0, -1):
        if G % cand == 0:
            gpt = cand
            break
    tk = gpt * groupsize

    # --- fused scale / (zero - 8*scale) slab: one small DMA per step --------
    scale = scales_and_zeros[..., 0].astype(jnp.float32)           # (G, N)
    zero = scales_and_zeros[..., 1].astype(jnp.float32)            # (G, N)
    sz = jnp.stack([scale, zero - 8.0 * scale], axis=1)            # (G, 2, N)

    wp = weight_packed
    if Np != N:
        wp = jnp.pad(wp, ((0, 0), (0, Np - N)))                    # padded cols dequant to 0
        sz = jnp.pad(sz, ((0, 0), (0, 0), (0, Np - N)))

    grid = (Mp // tm, Np // tn, G // gpt)

    kernel = functools.partial(_int4_matmul_kernel,
                               groupsize=groupsize, groups_per_tile=gpt)

    out = pl.pallas_call(
        kernel,
        out_shape=jax.ShapeDtypeStruct((Mp, Np), jnp.float32),
        grid_spec=pltpu.PrefetchScalarGridSpec(
            num_scalar_prefetch=0,
            grid=grid,
            in_specs=[
                pl.BlockSpec((tm, tk), lambda i, j, k: (i, k)),         # x (bf16)
                pl.BlockSpec((tk // 2, tn), lambda i, j, k: (k, j)),    # packed int4 weight
                pl.BlockSpec((gpt, 2, tn), lambda i, j, k: (k, 0, j)),  # scale / (zero-8*scale)
            ],
            out_specs=pl.BlockSpec((tm, tn), lambda i, j, k: (i, j)),   # resident accumulator
        ),
        compiler_params=pltpu.CompilerParams(
            dimension_semantics=("parallel", "parallel", "arbitrary")),
    )(x2d, wp, sz)

    out = out[:M, :N]
    return out.reshape(orig_shape[:-1] + (N,))


# --------------------------- packing / reference --------------------------- #
def pack_int4_weight(q_w, groupsize):
    """q_w: (N, K) int32 in [0, 15]  ->  (K//2, N) uint8 (layout documented above)."""
    N, K = q_w.shape
    G = K // groupsize
    q_t = q_w.T.reshape(G, groupsize, N)                 # k-major
    hi = q_t[:, : groupsize // 2, :]
    lo = q_t[:, groupsize // 2:, :]
    return ((hi << 4) | lo).astype(jnp.uint8).reshape(K // 2, N)


def reference_int4_linear(x, q_w, scales_and_zeros, groupsize):
    """Pure-JAX reference. Activations are run through bf16, mirroring the CUDA
    _weight_int4pack_mm path (input.to(torch.bfloat16))."""
    N, K = q_w.shape
    scale = jnp.repeat(scales_and_zeros[..., 0].T, groupsize, axis=1)   # (N, K)
    zero = jnp.repeat(scales_and_zeros[..., 1].T, groupsize, axis=1)    # (N, K)
    w = (q_w.astype(jnp.float32) - 8.0) * scale + zero                  # (N, K)
    x2d = x.reshape(-1, K).astype(jnp.bfloat16).astype(jnp.float32)
    out = x2d @ w.T
    return out.reshape(x.shape[:-1] + (N,))


# ---------------------------------- main ----------------------------------- #
if __name__ == "__main__":

    def run_case(*, batch, seq, in_features, out_features, groupsize,
                 origin_in_features, key):
        K = in_features
        G = K // groupsize
        k1, k2, k3, k4 = jax.random.split(key, 4)

        # Deterministic synthetic quantized parameters (no checkpoint loading).
        q_w = jax.random.randint(k1, (out_features, K), 0, 16, jnp.int32)
        scales = jax.random.uniform(k2, (G, out_features), jnp.float32) * 0.02 + 0.01
        zeros = jax.random.normal(k3, (G, out_features), jnp.float32) * 0.1
        scales_and_zeros = jnp.stack([scales, zeros], axis=-1)          # (G, N, 2)

        weight_packed = pack_int4_weight(q_w, groupsize)                # (K//2, N) uint8
        x = jax.random.normal(k4, (batch, seq, origin_in_features), jnp.float32)

        out = weight_only_int4_linear(
            x, weight_packed, scales_and_zeros,
            out_features=out_features, groupsize=groupsize,
            origin_in_features=origin_in_features)
        out = jax.block_until_ready(out)

        if origin_in_features != K:
            x_ref_in = jnp.pad(x, [(0, 0)] * (x.ndim - 1) + [(0, K - origin_in_features)])
        else:
            x_ref_in = x
        ref = reference_int4_linear(x_ref_in, q_w, scales_and_zeros, groupsize)

        assert out.shape == (batch, seq, out_features), out.shape
        err = float(jnp.max(jnp.abs(out - ref)))
        assert jnp.allclose(out, ref, rtol=1e-2, atol=1e-2), err

    key = jax.random.PRNGKey(0)

    # Case 1: no padding, single grid step (batch=2, seq=8, K=256, N=128, gs=128).
    run_case(batch=2, seq=8, in_features=256, out_features=128, groupsize=128,
             origin_in_features=256, key=jax.random.fold_in(key, 0))

    # Case 2: module padding branch (origin K=200 -> padded K=1024) + multi-group
    # K tiles and multi-step K-axis accumulation into the resident output block.
    run_case(batch=2, seq=8, in_features=1024, out_features=256, groupsize=128,
             origin_in_features=200, key=jax.random.fold_in(key, 1))

    print("KERNEL_OK")
</pallas_src>

<mosaic_0001>
module attributes {stable_mosaic.version = 11 : i64} {
  func.func @_int4_matmul_kernel(%arg0: i32, %arg1: i32, %arg2: i32, %arg3: memref<16x256xbf16, #tpu.memory_space<vmem>>, %arg4: memref<128x128xi8, #tpu.memory_space<vmem>>, %arg5: memref<2x2x128xf32, #tpu.memory_space<vmem>>, %arg6: memref<16x128xf32, #tpu.memory_space<vmem>>) attributes {dimension_semantics = [#tpu.dimension_semantics<parallel>, #tpu.dimension_semantics<parallel>, #tpu.dimension_semantics<arbitrary>], iteration_bounds = array<i64: 1, 1, 1>, scalar_prefetch = 0 : i64, scratch_operands = 0 : i64, tpu.core_type = #tpu.core_type<tc>, window_params = [{transform_indices = @transform_0, window_bounds = array<i64: 16, 256>}, {transform_indices = @transform_1, window_bounds = array<i64: 128, 128>}, {transform_indices = @transform_2, window_bounds = array<i64: 2, 2, 128>}, {transform_indices = @transform_3, window_bounds = array<i64: 16, 128>}]} {
    %c0_i32 = arith.constant 0 : i32
    %0 = arith.cmpi eq, %arg2, %c0_i32 : i32
    %1 = arith.extui %0 : i1 to i32
    %c0_i32_0 = arith.constant 0 : i32
    %2 = arith.cmpi ne, %1, %c0_i32_0 : i32
    scf.if %2 {
      %cst_28 = arith.constant 0.000000e+00 : f32
      %61 = vector.broadcast %cst_28 : f32 to vector<16x128xf32>
      %c0_29 = arith.constant 0 : index
      %c0_30 = arith.constant 0 : index
      %62 = vector.load %arg6[%c0_29, %c0_30] : memref<16x128xf32, #tpu.memory_space<vmem>>, vector<16x128xf32>
      tpu.vector_store %arg6[%c0_29, %c0_30], %61 {strides = array<i32>} : memref<16x128xf32, #tpu.memory_space<vmem>>, vector<16x128xf32>,
    } else {
    }
    %c0 = arith.constant 0 : index
    %c0_1 = arith.constant 0 : index
    %3 = vector.load %arg4[%c0, %c0_1] : memref<128x128xi8, #tpu.memory_space<vmem>>, vector<64x128xi8>
    %4 = arith.extui %3 : vector<64x128xi8> to vector<64x128xi32>
    %c4_i32 = arith.constant 4 : i32
    %5 = vector.broadcast %c4_i32 : i32 to vector<64x128xi32>
    %6 = arith.shrsi %4, %5 : vector<64x128xi32>
    %7 = arith.sitofp %6 : vector<64x128xi32> to vector<64x128xbf16>
    %c15_i32 = arith.constant 15 : i32
    %8 = vector.broadcast %c15_i32 : i32 to vector<64x128xi32>
    %9 = arith.andi %4, %8 : vector<64x128xi32>
    %10 = arith.sitofp %9 : vector<64x128xi32> to vector<64x128xbf16>
    %c0_2 = arith.constant 0 : index
    %c0_3 = arith.constant 0 : index
    %11 = vector.load %arg3[%c0_2, %c0_3] : memref<16x256xbf16, #tpu.memory_space<vmem>>, vector<16x128xbf16>
    %12 = vector.extract_strided_slice %11 {offsets = [0, 0], sizes = [16, 64], strides = [1, 1]} : vector<16x128xbf16> to vector<16x64xbf16>
    %13 = vector.extract_strided_slice %11 {offsets = [0, 64], sizes = [16, 64], strides = [1, 1]} : vector<16x128xbf16> to vector<16x64xbf16>
    %cst = arith.constant dense<0.000000e+00> : vector<16x128xf32>
    %14 = tpu.matmul %12, %7, %cst {dimension_numbers = #tpu.dot_dimension_numbers<[1], [0], [0], [1], [0, 0, 1, 1], [], []>} : vector<16x64xbf16>, vector<64x128xbf16>, vector<16x128xf32> -> vector<16x128xf32>
    %cst_4 = arith.constant dense<0.000000e+00> : vector<16x128xf32>
    %15 = tpu.matmul %13, %10, %cst_4 {dimension_numbers = #tpu.dot_dimension_numbers<[1], [0], [0], [1], [0, 0, 1, 1], [], []>} : vector<16x64xbf16>, vector<64x128xbf16>, vector<16x128xf32> -> vector<16x128xf32>
    %16 = arith.addf %14, %15 : vector<16x128xf32>
    %17 = arith.extf %11 : vector<16x128xbf16> to vector<16x128xf32>
    %cst_5 = arith.constant dense<0.000000e+00> : vector<16xf32>
    %18 = vector.multi_reduction <add>, %17, %cst_5 [1] : vector<16x128xf32> to vector<16xf32>
    %19 = vector.shape_cast %18 : vector<16xf32> to vector<16x1xf32>
    %c0_6 = arith.constant 0 : index
    %c0_7 = arith.constant 0 : index
    %c0_8 = arith.constant 0 : index
    %20 = vector.load %arg5[%c0_6, %c0_7, %c0_8] : memref<2x2x128xf32, #tpu.memory_space<vmem>>, vector<1x1x128xf32>
    %21 = vector.shape_cast %20 : vector<1x1x128xf32> to vector<1x128xf32>
    %c0_9 = arith.constant 0 : index
    %c1 = arith.constant 1 : index
    %c0_10 = arith.constant 0 : index
    %22 = vector.load %arg5[%c0_9, %c1, %c0_10] : memref<2x2x128xf32, #tpu.memory_space<vmem>>, vector<1x1x128xf32>
    %23 = vector.shape_cast %22 : vector<1x1x128xf32> to vector<1x128xf32>
    %24 = vector.broadcast %21 : vector<1x128xf32> to vector<16x128xf32>
    %25 = arith.mulf %16, %24 : vector<16x128xf32>
    %26 = vector.broadcast %19 : vector<16x1xf32> to vector<16x128xf32>
    %27 = vector.broadcast %23 : vector<1x128xf32> to vector<16x128xf32>
    %28 = arith.mulf %26, %27 : vector<16x128xf32>
    %29 = arith.addf %25, %28 : vector<16x128xf32>
    %c64 = arith.constant 64 : index
    %c0_11 = arith.constant 0 : index
    %30 = vector.load %arg4[%c64, %c0_11] : memref<128x128xi8, #tpu.memory_space<vmem>>, vector<64x128xi8>
    %31 = arith.extui %30 : vector<64x128xi8> to vector<64x128xi32>
    %c4_i32_12 = arith.constant 4 : i32
    %32 = vector.broadcast %c4_i32_12 : i32 to vector<64x128xi32>
    %33 = arith.shrsi %31, %32 : vector<64x128xi32>
    %34 = arith.sitofp %33 : vector<64x128xi32> to vector<64x128xbf16>
    %c15_i32_13 = arith.constant 15 : i32
    %35 = vector.broadcast %c15_i32_13 : i32 to vector<64x128xi32>
    %36 = arith.andi %31, %35 : vector<64x128xi32>
    %37 = arith.sitofp %36 : vector<64x128xi32> to vector<64x128xbf16>
    %c0_14 = arith.constant 0 : index
    %c128 = arith.constant 128 : index
    %38 = vector.load %arg3[%c0_14, %c128] : memref<16x256xbf16, #tpu.memory_space<vmem>>, vector<16x128xbf16>
    %39 = vector.extract_strided_slice %38 {offsets = [0, 0], sizes = [16, 64], strides = [1, 1]} : vector<16x128xbf16> to vector<16x64xbf16>
    %40 = vector.extract_strided_slice %38 {offsets = [0, 64], sizes = [16, 64], strides = [1, 1]} : vector<16x128xbf16> to vector<16x64xbf16>
    %cst_15 = arith.constant dense<0.000000e+00> : vector<16x128xf32>
    %41 = tpu.matmul %39, %34, %cst_15 {dimension_numbers = #tpu.dot_dimension_numbers<[1], [0], [0], [1], [0, 0, 1, 1], [], []>} : vector<16x64xbf16>, vector<64x128xbf16>, vector<16x128xf32> -> vector<16x128xf32>
    %cst_16 = arith.constant dense<0.000000e+00> : vector<16x128xf32>
    %42 = tpu.matmul %40, %37, %cst_16 {dimension_numbers = #tpu.dot_dimension_numbers<[1], [0], [0], [1], [0, 0, 1, 1], [], []>} : vector<16x64xbf16>, vector<64x128xbf16>, vector<16x128xf32> -> vector<16x128xf32>
    %43 = arith.addf %41, %42 : vector<16x128xf32>
    %44 = arith.extf %38 : vector<16x128xbf16> to vector<16x128xf32>
    %cst_17 = arith.constant dense<0.000000e+00> : vector<16xf32>
    %45 = vector.multi_reduction <add>, %44, %cst_17 [1] : vector<16x128xf32> to vector<16xf32>
    %46 = vector.shape_cast %45 : vector<16xf32> to vector<16x1xf32>
    %c1_18 = arith.constant 1 : index
    %c0_19 = arith.constant 0 : index
    %c0_20 = arith.constant 0 : index
    %47 = vector.load %arg5[%c1_18, %c0_19, %c0_20] : memref<2x2x128xf32, #tpu.memory_space<vmem>>, vector<1x1x128xf32>
    %48 = vector.shape_cast %47 : vector<1x1x128xf32> to vector<1x128xf32>
    %c1_21 = arith.constant 1 : index
    %c1_22 = arith.constant 1 : index
    %c0_23 = arith.constant 0 : index
    %49 = vector.load %arg5[%c1_21, %c1_22, %c0_23] : memref<2x2x128xf32, #tpu.memory_space<vmem>>, vector<1x1x128xf32>
    %50 = vector.shape_cast %49 : vector<1x1x128xf32> to vector<1x128xf32>
    %51 = vector.broadcast %48 : vector<1x128xf32> to vector<16x128xf32>
    %52 = arith.mulf %43, %51 : vector<16x128xf32>
    %53 = vector.broadcast %46 : vector<16x1xf32> to vector<16x128xf32>
    %54 = vector.broadcast %50 : vector<1x128xf32> to vector<16x128xf32>
    %55 = arith.mulf %53, %54 : vector<16x128xf32>
    %56 = arith.addf %52, %55 : vector<16x128xf32>
    %57 = arith.addf %29, %56 : vector<16x128xf32>
    %c0_24 = arith.constant 0 : index
    %c0_25 = arith.constant 0 : index
    %58 = vector.load %arg6[%c0_24, %c0_25] : memref<16x128xf32, #tpu.memory_space<vmem>>, vector<16x128xf32>
    %59 = arith.addf %58, %57 : vector<16x128xf32>
    %c0_26 = arith.constant 0 : index
    %c0_27 = arith.constant 0 : index
    %60 = vector.load %arg6[%c0_26, %c0_27] : memref<16x128xf32, #tpu.memory_space<vmem>>, vector<16x128xf32>
    tpu.vector_store %arg6[%c0_26, %c0_27], %59 {strides = array<i32>} : memref<16x128xf32, #tpu.memory_space<vmem>>, vector<16x128xf32>,
    return
  }
  func.func @transform_0(%arg0: i32, %arg1: i32, %arg2: i32) -> (i32, i32) {
    %c0_i32 = arith.constant 0 : i32
    return %arg0, %arg2 : i32, i32
  }
  func.func @transform_1(%arg0: i32, %arg1: i32, %arg2: i32) -> (i32, i32) {
    %c0_i32 = arith.constant 0 : i32
    return %arg2, %arg1 : i32, i32
  }
  func.func @transform_2(%arg0: i32, %arg1: i32, %arg2: i32) -> (i32, i32, i32) {
    %c0_i32 = arith.constant 0 : i32
    %c0_i32_0 = arith.constant 0 : i32
    return %arg2, %c0_i32, %arg1 : i32, i32, i32
  }
  func.func @transform_3(%arg0: i32, %arg1: i32, %arg2: i32) -> (i32, i32) {
    %c0_i32 = arith.constant 0 : i32
    return %arg0, %arg1 : i32, i32
  }
}

</mosaic_0001>

<bundles_post_ra>
// kernel: tpu_custom_call.1
= control target key start
LH: loop header
LB: loop body
LE: loop exit
PB: predicated region body
PF: predicated region fallthrough
CT: control target
= control target key end

     0   :  { %8 = vsyncpa [#allocation3], 0  ;;  %s732_s0 = inlined_call_operand.hbm [shape: bf16[16,256], index: 0, kind: input, shape index: {}]   ;;  %s733_s1 = inlined_call_operand.hbm [shape: u8[128,128], index: 1, kind: input, shape index: {}]   ;;  %s734_s2 = inlined_call_operand.hbm [shape: f32[2,2,128], index: 2, kind: input, shape index: {}]   ;;  %s735_s3 = inlined_call_operand.hbm [shape: f32[16,128], index: 3, kind: output, shape index: {}]  }
   0x1   :  { %9 = vsyncpa [#allocation6], 0 }
   0x2   :  { %10 = vsyncpa [#allocation4], 0  ;;  %s622_s12 = smov [#allocation5]   ;;  %s623_s14 = smov [#allocation2]  }
   0x3   :  { %s28_s13 = sshll.u32 %s622_s12, 4  ;;  %s16_s15 = sshll.u32 %s623_s14, 4  ;;  %s29_s13 = int_to_ptr.vmem [resolvable:$true] %s28_s13  ;;  %s17_s15 = int_to_ptr.vmem [resolvable:$true] %s16_s15 }
   0x4   :  { %s544_s16 = scalar_lea.vmem %s29_s13, 512  ;;  %p549_p1 = scmp.lt.s32.totalorder %s29_s13, %s29_s13 }
   0x5   :  { %p545_p0 = scmp.ne.s32.totalorder %s29_s13, %s544_s16  ;;  %p550_p2 = scmp.lt.s32.totalorder %s544_s16, %s544_s16 }
   0x7   :  { %p551_p3 = por %p550_p2, %p549_p1 }
   0x9   :  { %p552_p4 = pnand %p551_p3, %p545_p0 }
   0xb   :  { %555 = shalt.err (!%p552_p4)
}
   0xc   :  { %s624_s17 = smov 128   ;;  %s625_s18 = smov 8  }
   0xd   :  { %34 = dma.hbm_to_vmem [thread:$0]  %s733_s1, 512, %s29_s13, [#allocation6], %s624_s17, %s624_s17, %s625_s18  }
   0xe   :  { %s564_s21 = scalar_lea.vmem %s17_s15, 256  ;;  %p569_p6 = scmp.lt.s32.totalorder %s17_s15, %s17_s15 }
   0xf   :  { %p565_p5 = scmp.ne.s32.totalorder %s17_s15, %s564_s21  ;;  %p570_p7 = scmp.lt.s32.totalorder %s564_s21, %s564_s21 }
  0x11   :  { %p571_p8 = por %p570_p7, %p569_p6 }
  0x13   :  { %p572_p9 = pnand %p571_p8, %p565_p5 }
  0x15   :  { %575 = shalt.err (!%p572_p9)
}
  0x16   :  { %22 = dma.hbm_to_vmem [thread:$0]  %s732_s0, 256, %s17_s15, [#allocation3], %s624_s17, %s624_s17, %s625_s18  }
  0x17   :  { %s626_s24 = smov [#allocation7]  }
  0x18   :  { %s40_s25 = sshll.u32 %s626_s24, 4  ;;  %s41_s25 = int_to_ptr.vmem [resolvable:$true] %s40_s25 }
  0x19   :  { %s584_s26 = scalar_lea.vmem %s41_s25, 64  ;;  %p589_p11 = scmp.lt.s32.totalorder %s41_s25, %s41_s25 }
  0x1a   :  { %p585_p10 = scmp.ne.s32.totalorder %s41_s25, %s584_s26  ;;  %p590_p12 = scmp.lt.s32.totalorder %s584_s26, %s584_s26 }
  0x1c   :  { %p591_p13 = por %p590_p12, %p589_p11 }
  0x1e   :  { %p592_p0 = pnand %p591_p13, %p585_p10 }
  0x20   :  { %595 = shalt.err (!%p592_p0)
}
  0x21   :  { %s627_s1 = smov 32   ;;  %s628_s27 = smov 2  }
  0x22   :  { %46 = dma.hbm_to_vmem [thread:$0]  %s734_s2, 64, %s41_s25, [#allocation6], %s627_s1, %s627_s1, %s628_s27  }
  0x23   :  { %616 = dma.done.wait [#allocation3], 256  }
  0x24   :  { %617 = vsyncadd [#allocation3], 4294967040 }
  0x25   :  { %618 = dma.done.wait [#allocation6], 576  }
  0x26   :  { %619 = vsyncadd [#allocation6], 4294966720  ;;  %v629_v0 = vmov 0.0   ;;  %vm630_vm0 = vmmov 0   ;;  %v674_v1 = vld [vmem:[#allocation2] sm:$0xf] }
  0x27   :  { %487 = vmatprep.subr.bf16.mxu1 %v629_v0  ;;  %475 = vmatprep.subr.bf16.mxu0 %v629_v0  ;;  %v676_v2 = vld [vmem:[#allocation2 + $0x8] sm:$0xf]  ;;  %v678_v3 = vld [vmem:[#allocation2 + $0x4] sm:$0xf]  ;;  %v684_v5 = vld [vmem:[#allocation2 + $0xc] sm:$0xf] }
  0x28   :  { %495 = vmatprep.mubr.msk.bf16.mxu1 %vm630_vm0, %v629_v0  ;;  %483 = vmatprep.mubr.msk.bf16.mxu0 %vm630_vm0, %v629_v0  ;;  %v682_v4 = vcombine.low %v674_v1, %v676_v2  ;;  %v64_v6 = vld [vmem:[#allocation5 + $0x8] sm:$0xff]  ;;  %v63_v7 = vld [vmem:[#allocation5] sm:$0xff]  ;;  %v688_v8 = vcombine.low %v678_v3, %v684_v5  ;;  %s631_s0 = smov 64   ;;  %v242_v43 = vld [vmem:[#allocation5 + $0x18] sm:$0xff]  ;;  %vm130_vm1 = vcmask 523264   ;;  %s632_s2 = smov [#allocation8]  }
  0x29   :  { %v71_v9 = vunpack.c.2.s8 %v64_v6  ;;  %v72_v10 = vunpack.c.3.s8 %v64_v6  ;;  %v69_v11 = vunpack.c.0.s8 %v64_v6  ;;  %v70_v12 = vunpack.c.1.s8 %v64_v6  ;;  %s432_s30 = sshll.u32 %s632_s2, 4  ;;  %s433_s30 = int_to_ptr.vmem [resolvable:$true] %s432_s30 }
  0x2a   :  { %128 = vrot.lane.b32.xlu0 %v682_v4, %s631_s0  ;;  %v67_v13 = vunpack.c.2.s8 %v63_v7  ;;  %v68_v14 = vunpack.c.3.s8 %v63_v7  ;;  %v65_v15 = vunpack.c.0.s8 %v63_v7  ;;  %v66_v19 = vunpack.c.1.s8 %v63_v7  ;;  %s596_s4 = scalar_lea.vmem %s433_s30, 256  ;;  %p601_p2 = scmp.lt.s32.totalorder %s433_s30, %s433_s30 }
  0x2b   :  { %v79_v16 = vand.u32 255, %v71_v9  ;;  %v80_v17 = vand.u32 255, %v72_v10  ;;  %v77_v18 = vand.u32 255, %v69_v11  ;;  %v78_v20 = vand.u32 255, %v70_v12  ;;  %v241_v11 = vld [vmem:[#allocation5 + $0x10] sm:$0xff]  ;;  %p597_p1 = scmp.ne.s32.totalorder %s433_s30, %s596_s4  ;;  %p602_p3 = scmp.lt.s32.totalorder %s596_s4, %s596_s4 }
  0x2c   :  { %v75_v21 = vand.u32 255, %v67_v13  ;;  %v76_v22 = vand.u32 255, %v68_v14  ;;  %v73_v23 = vand.u32 255, %v65_v15  ;;  %v74_v42 = vand.u32 255, %v66_v19 }
  0x2d   :  { %v87_v24 = vshra.s32 %v79_v16, 4  ;;  %v88_v25 = vshra.s32 %v80_v17, 4  ;;  %v85_v26 = vshra.s32 %v77_v18, 4  ;;  %v107_v27 = vand.u32 15, %v79_v16  ;;  %p603_p4 = por %p602_p3, %p601_p2 }
  0x2e   :  { %306 = vrot.lane.b32.xlu0 %v688_v8, %s631_s0  ;;  %v86_v28 = vshra.s32 %v78_v20, 4  ;;  %v108_v29 = vand.u32 15, %v80_v17  ;;  %v83_v30 = vshra.s32 %v75_v21, 4  ;;  %v84_v31 = vshra.s32 %v76_v22, 4 }
  0x2f   :  { %v95_v32 = vcvt.s32.f32 %v87_v24  ;;  %v96_v33 = vcvt.s32.f32 %v88_v25  ;;  %v93_v34 = vcvt.s32.f32 %v85_v26  ;;  %v115_v35 = vcvt.s32.f32 %v107_v27  ;;  %p604_p5 = pnand %p603_p4, %p597_p1 }
  0x30   :  { %v94_v36 = vcvt.s32.f32 %v86_v28  ;;  %v116_v37 = vcvt.s32.f32 %v108_v29  ;;  %v91_v38 = vcvt.s32.f32 %v83_v30  ;;  %v105_v40 = vand.u32 15, %v77_v18 }
  0x31   :  { %v100_v39 = vpack.c.bf16 %v96_v33, %v95_v32  ;;  %v106_v41 = vand.u32 15, %v78_v20  ;;  %v92_v46 = vcvt.s32.f32 %v84_v31  ;;  %v81_v47 = vshra.s32 %v73_v23, 4 }
  0x32   :  { %v99_v44 = vpack.c.bf16 %v94_v36, %v93_v34  ;;  %v120_v45 = vpack.c.bf16 %v116_v37, %v115_v35  ;;  %v113_v48 = vcvt.s32.f32 %v105_v40  ;;  %v82_v50 = vshra.s32 %v74_v42, 4 }
  0x33   :  { %488 = vmatpush3.bf16.msra.mxu1 %v100_v39  ;;  %v114_v49 = vcvt.s32.f32 %v106_v41  ;;  %v103_v51 = vand.u32 15, %v75_v21  ;;  %v89_v52 = vcvt.s32.f32 %v81_v47  ;;  %v104_v53 = vand.u32 15, %v76_v22 }
  0x34   :  { %489 = vmatprep.subr.bf16.mxu1 %v629_v0  ;;  %476 = vmatpush3.bf16.msra.mxu0 %v120_v45  ;;  %v249_v54 = vunpack.c.2.s8 %v242_v43  ;;  %v250_v55 = vunpack.c.3.s8 %v242_v43  ;;  %v90_v57 = vcvt.s32.f32 %v82_v50  ;;  %v101_v59 = vand.u32 15, %v73_v23 }
  0x35   :  { %477 = vmatprep.subr.bf16.mxu0 %v629_v0  ;;  %v119_v56 = vpack.c.bf16 %v114_v49, %v113_v48  ;;  %v111_v58 = vcvt.s32.f32 %v103_v51  ;;  %v112_v60 = vcvt.s32.f32 %v104_v53  ;;  %v102_v63 = vand.u32 15, %v74_v42 }
  0x36   :  { %v257_v61 = vand.u32 255, %v249_v54  ;;  %v258_v62 = vand.u32 255, %v250_v55  ;;  %v98_v6 = vpack.c.bf16 %v92_v46, %v91_v38  ;;  %v109_v7 = vcvt.s32.f32 %v101_v59 }
  0x37   :  { %490 = vmatpush3.bf16.msra.mxu1 %v99_v44  ;;  %v247_v9 = vunpack.c.0.s8 %v242_v43  ;;  %v248_v10 = vunpack.c.1.s8 %v242_v43  ;;  %v118_v12 = vpack.c.bf16 %v112_v60, %v111_v58  ;;  %v110_v15 = vcvt.s32.f32 %v102_v63 }
  0x38   :  { %491 = vmatprep.subr.bf16.mxu1 %v629_v0  ;;  %478 = vmatpush3.bf16.msra.mxu0 %v119_v56  ;;  %v265_v13 = vshra.s32 %v257_v61, 4  ;;  %v266_v14 = vshra.s32 %v258_v62, 4  ;;  %v285_v18 = vand.u32 15, %v257_v61  ;;  %v286_v19 = vand.u32 15, %v258_v62 }
  0x39   :  { %479 = vmatprep.subr.bf16.mxu0 %v629_v0  ;;  %v255_v16 = vand.u32 255, %v247_v9  ;;  %v256_v17 = vand.u32 255, %v248_v10  ;;  %v97_v20 = vpack.c.bf16 %v90_v57, %v89_v52  ;;  %v245_v23 = vunpack.c.2.s8 %v241_v11 }
  0x3a   :  { %v273_v21 = vcvt.s32.f32 %v265_v13  ;;  %v274_v22 = vcvt.s32.f32 %v266_v14  ;;  %v696_v26 = vcvt.s32.f32 %v285_v18  ;;  %v698_v27 = vcvt.s32.f32 %v286_v19 }
  0x3b   :  { %492 = vmatpush3.bf16.msra.mxu1 %v98_v6  ;;  %v263_v24 = vshra.s32 %v255_v16, 4  ;;  %v264_v25 = vshra.s32 %v256_v17, 4  ;;  %v117_v28 = vpack.c.bf16 %v110_v15, %v109_v7  ;;  %v246_v29 = vunpack.c.3.s8 %v241_v11 }
  0x3c   :  { %493 = vmatprep.subr.bf16.mxu1 %v629_v0  ;;  %480 = vmatpush3.bf16.msra.mxu0 %v118_v12  ;;  %v253_v30 = vand.u32 255, %v245_v23  ;;  %v283_v31 = vand.u32 15, %v255_v16  ;;  %v298_v34 = vpack.c.bf16 %v698_v27, %v696_v26  ;;  %v284_v35 = vand.u32 15, %v256_v17  ;;  %v449_v23 = vld [vmem:[#allocation7 + $0x1] ss:$0 sm:$0xff] }
  0x3d   :  { %481 = vmatprep.subr.bf16.mxu0 %v629_v0  ;;  %v271_v32 = vcvt.s32.f32 %v263_v24  ;;  %v272_v33 = vcvt.s32.f32 %v264_v25  ;;  %v254_v36 = vand.u32 255, %v246_v29  ;;  %v243_v39 = vunpack.c.0.s8 %v241_v11  ;;  %v448_v24 = vld [vmem:[#allocation7] ss:$0 sm:$0xff]  ;;  %v454_v25 = vld [vmem:[#allocation7 + $0x3] ss:$0 sm:$0xff] }
  0x3e   :  { %v261_v37 = vshra.s32 %v253_v30, 4  ;;  %v291_v38 = vcvt.s32.f32 %v283_v31  ;;  %v278_v40 = vpack.c.bf16 %v274_v22, %v273_v21  ;;  %v292_v41 = vcvt.s32.f32 %v284_v35  ;;  %v453_v29 = vld [vmem:[#allocation7 + $0x2] ss:$0 sm:$0xff] }
  0x3f   :  { %494 = vmatpush3.bf16.msra.mxu1 %v97_v20  ;;  %v244_v42 = vunpack.c.1.s8 %v241_v11  ;;  %v281_v43 = vand.u32 15, %v253_v30  ;;  %v262_v44 = vshra.s32 %v254_v36, 4  ;;  %v251_v45 = vand.u32 255, %v243_v39 }
  0x40   :  { %511 = vmatprep.subr.bf16.mxu1 %v629_v0  ;;  %482 = vmatpush3.bf16.msra.mxu0 %v117_v28  ;;  %v282_v46 = vand.u32 15, %v254_v36  ;;  %v297_v47 = vpack.c.bf16 %v292_v41, %v291_v38  ;;  %v219_v50 = vunpack.c.l.bf16 %v674_v1  ;;  %v277_v51 = vpack.c.bf16 %v272_v33, %v271_v32 }
  0x41   :  { %499 = vmatprep.subr.bf16.mxu0 %v629_v0  ;;  %v252_v48 = vand.u32 255, %v244_v42  ;;  %v289_v49 = vcvt.s32.f32 %v281_v43  ;;  %v269_v52 = vcvt.s32.f32 %v261_v37  ;;  %v279_v54 = vand.u32 15, %v251_v45 }
  0x42   :  { %496 = vmatmul.mubr.msk.bf16.vlgmr.msra.gmra.mxu1 %vm130_vm1, %v682_v4  ;;  %v290_v53 = vcvt.s32.f32 %v282_v46  ;;  %v270_v55 = vcvt.s32.f32 %v262_v44  ;;  %v259_v56 = vshra.s32 %v251_v45, 4  ;;  %221 = vadd.xlane.f32.xlu1 %v219_v50  ;;  %v220_v1 = vunpack.c.l.bf16 %v676_v2 }
  0x43   :  { %512 = vmatpush3.bf16.msra.mxu1 %v278_v40  ;;  %v260_v57 = vshra.s32 %v252_v48, 4  ;;  %519 = vmatprep.mubr.msk.bf16.mxu1 %vm630_vm0, %v629_v0  ;;  %v280_v58 = vand.u32 15, %v252_v48  ;;  %v287_v60 = vcvt.s32.f32 %v279_v54  ;;  %v397_v7 = vunpack.c.l.bf16 %v684_v5 }
  0x44   :  { %513 = vmatprep.subr.bf16.mxu1 %v629_v0  ;;  %v296_v59 = vpack.c.bf16 %v290_v53, %v289_v49  ;;  %v276_v61 = vpack.c.bf16 %v270_v55, %v269_v52  ;;  %v267_v62 = vcvt.s32.f32 %v259_v56  ;;  %v396_v9 = vunpack.c.l.bf16 %v678_v3 }
  0x45   :  { %v288_v4 = vcvt.s32.f32 %v280_v58  ;;  %v268_v63 = vcvt.s32.f32 %v260_v57 }
  0x46   :  { %223 = vadd.xlane.f32.xlu1 %v220_v1 }
  0x47   :  { %514 = vmatpush3.bf16.msra.mxu1 %v277_v51  ;;  %v295_v6 = vpack.c.bf16 %v288_v4, %v287_v60  ;;  %v275_v10 = vpack.c.bf16 %v268_v63, %v267_v62 }
  0x48   :  { %515 = vmatprep.subr.bf16.mxu1 %v629_v0 }
  0x4a   :  { %400 = vadd.xlane.f32.xlu1 %v397_v7 }
  0x4b   :  { %516 = vmatpush3.bf16.msra.mxu1 %v276_v61 }
  0x4c   :  { %517 = vmatprep.subr.bf16.mxu1 %v629_v0 }
  0x4d   :  { %398 = vadd.xlane.f32.xlu0 %v396_v9 }
  0x4f   :  { %518 = vmatpush3.bf16.msra.mxu1 %v275_v10 }
  0x52   :  { %520 = vmatmul.mubr.msk.bf16.vlgmr.msra.gmra.mxu1 %vm130_vm1, %v688_v8 }
  0x9c   :  { %v129_v2 = vpop.permute.xlu0 %128 }
  0x9d   :  { %484 = vmatmul.mubr.msk.bf16.vlgmr.msra.gmra.mxu0 %vm130_vm1, %v129_v2 }
  0x9e   :  { %500 = vmatpush3.bf16.msra.mxu0 %v298_v34  ;;  %507 = vmatprep.mubr.msk.bf16.mxu0 %vm630_vm0, %v629_v0 }
  0x9f   :  { %501 = vmatprep.subr.bf16.mxu0 %v629_v0 }
  0xa0   :  { %v307_v3 = vpop.permute.xlu0 %306 }
  0xa2   :  { %502 = vmatpush3.bf16.msra.mxu0 %v297_v47 }
  0xa3   :  { %503 = vmatprep.subr.bf16.mxu0 %v629_v0 }
  0xa6   :  { %504 = vmatpush3.bf16.msra.mxu0 %v296_v59 }
  0xa7   :  { %505 = vmatprep.subr.bf16.mxu0 %v629_v0 }
  0xaa   :  { %506 = vmatpush3.bf16.msra.mxu0 %v295_v6 }
  0xad   :  { %508 = vmatmul.mubr.msk.bf16.vlgmr.msra.gmra.mxu0 %vm130_vm1, %v307_v3 }
  0xcb   :  { %v222_v21 = vpop.xlane.xlu1 %221 }
  0xcc   :  { %v237_v27 = vmul.f32 %v449_v23, %v222_v21 }
  0xcf   :  { %v224_v0 = vpop.xlane.xlu1 %223 }
  0xd0   :  { %v238_v37 = vmul.f32 %v449_v23, %v224_v0 }
  0xd3   :  { %v401_v34 = vpop.xlane.xlu1 %400 }
  0xd4   :  { %v416_v39 = vmul.f32 %v454_v25, %v401_v34 }
  0xd6   :  { %v399_v26 = vpop.xlane.xlu0 %398 }
  0xd7   :  { %v415_v33 = vmul.f32 %v454_v25, %v399_v26 }
 0x102   :  { %v212_v5 = vpop.f32.mrf.mxu1 }
 0x104   :  { %v497_v8 = vpop.f32.mrf.mxu1 }
 0x106   :  { %v215_v11 = vpop.f32.mrf.mxu1 }
 0x108   :  { %v498_v12 = vpop.f32.mrf.mxu1 }
 0x112   :  { %v389_v13 = vpop.f32.mrf.mxu1 }
 0x114   :  { %v521_v14 = vpop.f32.mrf.mxu1 }
 0x116   :  { %v392_v15 = vpop.f32.mrf.mxu1 }
 0x118   :  { %v522_v16 = vpop.f32.mrf.mxu1 }
 0x15d   :  { %v168_v17 = vpop.f32.mrf.mxu0 }
 0x15e   :  { %v213_v22 = vadd.f32 %v212_v5, %v168_v17 }
 0x15f   :  { %v485_v18 = vpop.f32.mrf.mxu0 }
 0x160   :  { %v231_v30 = vmul.f32 %v448_v24, %v213_v22 }
 0x161   :  { %v171_v19 = vpop.f32.mrf.mxu0 }
 0x162   :  { %v216_v31 = vadd.f32 %v215_v11, %v171_v19  ;;  %v239_v40 = vadd.f32 %v237_v27, %v231_v30 }
 0x163   :  { %v486_v20 = vpop.f32.mrf.mxu0 }
 0x164   :  { %v232_v41 = vmul.f32 %v448_v24, %v216_v31 }
 0x166   :  { %v240_v47 = vadd.f32 %v238_v37, %v232_v41 }
 0x16d   :  { %v345_v28 = vpop.f32.mrf.mxu0 }
 0x16e   :  { %v390_v32 = vadd.f32 %v389_v13, %v345_v28 }
 0x16f   :  { %v509_v35 = vpop.f32.mrf.mxu0 }
 0x170   :  { %v409_v36 = vmul.f32 %v453_v29, %v390_v32 }
 0x171   :  { %v348_v38 = vpop.f32.mrf.mxu0 }
 0x172   :  { %v417_v42 = vadd.f32 %v415_v33, %v409_v36  ;;  %v393_v43 = vadd.f32 %v392_v15, %v348_v38 }
 0x173   :  { %v510_v44 = vpop.f32.mrf.mxu0 }
 0x174   :  { %v419_v45 = vadd.f32 %v417_v42, %v239_v40  ;;  %v410_v46 = vmul.f32 %v453_v29, %v393_v43 }
 0x176   :  { %v418_v48 = vadd.f32 %v416_v39, %v410_v46  ;;  %425 = vst [vmem:[#allocation8] sm:$0xff] %v419_v45 }
 0x178   :  { %v420_v49 = vadd.f32 %v418_v48, %v240_v47 }
 0x17a   :  { %426 = vst [vmem:[#allocation8 + $0x8] sm:$0xff] %v420_v49 }
 0x17b   :  { %607 = shalt.err (!%p604_p5)
}
 0x17c   :  { %438 = dma.vmem_to_hbm [thread:$0]  %s433_s30, 256, %s735_s3, [#allocation4], %s624_s17, %s624_s17, %s625_s18  }
 0x17d   :  { %620 = dma.done.wait [#allocation4], 256  }
 0x17e   :  { %621 = vsyncadd [#allocation4], 4294967040 }
 0x17f   :  { %442 = vsyncpa [#allocation3], 1 }
 0x180   :  { %443 = vsyncpa [#allocation6], 1 }
 0x181   :  { %444 = vsyncpa [#allocation4], 1 }

</bundles_post_ra>
